<compile_context>
chip_gen: v6e
topology: v6e:2x2x1
jax: 0.10.0
libtpu: 0.0.40
codegen_flags: <defaults>
</compile_context>

<pallas_src>
import functools

import jax
import jax.numpy as jnp
import numpy as np
from jax.experimental import pallas as pl
from jax.experimental.pallas import tpu as pltpu

LANE = 128
SUBLANE = 8


def _round_up(x, m):
    return (x + m - 1) // m * m


# ----------------------------------------------------------------------------
# Kernel A (stride == -1 path): social pooling only.
#   z      : (TR, D+E)   rows = (time*batch*person), cols = [feat | mean_emb]
#   wpool  : (D+E, 128)  [wpf ; wpe] zero-padded to 128 lanes
#   pooled : (TR, 128)   relu(z @ wpool + bp)   (cols >= NPOOL are zero)
# ----------------------------------------------------------------------------
def pool_kernel(z_ref, wpool_ref, bp_ref, pooled_ref):
    pooled_ref[...] = jnp.maximum(
        jnp.dot(z_ref[...], wpool_ref[...],
                preferred_element_type=jnp.float32) + bp_ref[...],
        0.0)


def social_pool(z, wpool, bp, *, tile_rows=1024):
    """z: (R, D+E) -> pooled (R, 128) (lane-dense, cols >= NPOOL zero)."""
    R, DIN = z.shape
    PW = wpool.shape[1]
    TR = min(tile_rows, _round_up(R, SUBLANE))
    Rp = _round_up(R, TR)
    if Rp != R:
        z = jnp.pad(z, ((0, Rp - R), (0, 0)))

    pooled = pl.pallas_call(
        pool_kernel,
        out_shape=jax.ShapeDtypeStruct((Rp, PW), jnp.float32),
        grid=(Rp // TR,),
        in_specs=[
            pl.BlockSpec((TR, DIN), lambda r: (r, 0)),
            pl.BlockSpec((DIN, PW), lambda r: (0, 0)),
            pl.BlockSpec((1, PW), lambda r: (0, 0)),
        ],
        out_specs=pl.BlockSpec((TR, PW), lambda r: (r, 0)),
        compiler_params=pltpu.CompilerParams(
            dimension_semantics=("parallel",)),
    )(z, wpool, bp)
    return pooled[:R]


# ----------------------------------------------------------------------------
# Kernel B (stride != -1 path): fully fused social-pool + GRU + hid_linear.
#
#   z   : (S, TN, D+E)  per-person rows for one person-tile, all time steps
#   out : (TN, 128)     hid_linear(h_S)   (cols >= NOUT are zero)
#
# Phase 1 (parallel over t): xg[t] = relu(z[t] @ wpool + bp) @ wi + bi is
# written to a VMEM scratch (never to HBM).
# Phase 2 (serial): GRU recurrence; only h @ [W_hr|W_hz|W_hn] is on the chain,
# gates use one sigmoid over the fused [r|z] span + one tanh per step.
# ----------------------------------------------------------------------------
def fused_pool_gru_kernel(z_ref, wpool_ref, bp_ref, wi_ref, bi_ref,
                          wh_ref, hb_ref, wo_ref, bo_ref,
                          out_ref, xg_ref, *, hidden, unroll):
    S, TN, _ = z_ref.shape
    H = hidden

    # ---- Phase 1: pool + GRU input projection into the VMEM scratch. ----
    wpool = wpool_ref[...]
    bp = bp_ref[...]
    wi = wi_ref[...]
    bi = bi_ref[...]

    def proj(t, carry):
        pooled = jnp.maximum(
            jnp.dot(z_ref[t], wpool, preferred_element_type=jnp.float32) + bp,
            0.0)
        xg_ref[t] = (jnp.dot(pooled, wi, preferred_element_type=jnp.float32)
                     + bi)
        return carry

    jax.lax.fori_loop(0, S, proj, 0, unroll=unroll)

    # ---- Phase 2: serial GRU recurrence (h carried in vregs). ----
    wh = wh_ref[...]          # (H, GW)  fused [W_hr | W_hz | W_hn], zero-pad
    hb = hb_ref[...]          # (1, GW)  b_hn at lanes [2H:3H), else 0

    def step(t, h):
        xg = xg_ref[t]                                             # (TN, GW)
        hg = jnp.dot(h, wh, preferred_element_type=jnp.float32) + hb
        rz = jax.nn.sigmoid(xg[:, 0:2 * H] + hg[:, 0:2 * H])      # 1 EUP push
        r = rz[:, 0:H]
        zg = rz[:, H:2 * H]
        ng = jnp.tanh(xg[:, 2 * H:3 * H] + r * hg[:, 2 * H:3 * H])  # 1 push
        return (1.0 - zg) * ng + zg * h

    h0 = jnp.zeros((TN, H), dtype=jnp.float32)
    h = jax.lax.fori_loop(0, S, step, h0, unroll=unroll)

    # ---- hid_linear on the final hidden state; lane-dense 128-wide store.
    out_ref[...] = (jnp.dot(h, wo_ref[...], preferred_element_type=jnp.float32)
                    + bo_ref[...])


def fused_encode(z, wpool, bp, wi, bi, wh, hb, wo, bo, *, hidden,
                 tile_n=256, scratch_cap_bytes=4 << 20):
    """z: (S, N, D+E) -> (N, OW) = hid_linear(GRU final state per person)."""
    S, N0, DIN = z.shape
    PW = wpool.shape[1]
    GW = wi.shape[1]
    OW = wo.shape[1]

    # Person-tile size: bounded so the per-tile xg scratch stays small enough
    # for v7x's 64 MiB VMEM (32 MiB default scoped limit), rounded to sublanes.
    tn_cap = max(SUBLANE,
                 (scratch_cap_bytes // (S * GW * 4)) // SUBLANE * SUBLANE)
    TN = min(tile_n, tn_cap, _round_up(N0, SUBLANE))
    TN = max(SUBLANE, (TN // SUBLANE) * SUBLANE)
    Npad = _round_up(N0, TN)
    if Npad != N0:
        z = jnp.pad(z, ((0, 0), (0, Npad - N0), (0, 0)))

    unroll = S if S <= 16 else 4
    kern = functools.partial(fused_pool_gru_kernel, hidden=hidden,
                             unroll=unroll)

    # Explicit VMEM budget: z block (x2 buffers) + xg scratch + out (x2) +
    # weight slabs (x2), with a generous safety factor; never below the
    # 32 MiB default, never above v7x's 64 MiB physical VMEM.
    w_bytes = 4 * (DIN * PW + PW + PW * GW + GW + hidden * GW + GW
                   + hidden * OW + OW)
    need = 4 * (2 * S * TN * DIN + S * TN * GW + 2 * TN * OW) + 2 * w_bytes
    vmem_limit = int(min(max(4 * need, 32 << 20), 64 << 20))

    out = pl.pallas_call(
        kern,
        out_shape=jax.ShapeDtypeStruct((Npad, OW), jnp.float32),
        grid=(Npad // TN,),
        in_specs=[
            pl.BlockSpec((S, TN, DIN), lambda i: (0, i, 0)),
            pl.BlockSpec((DIN, PW), lambda i: (0, 0)),
            pl.BlockSpec((1, PW), lambda i: (0, 0)),
            pl.BlockSpec((PW, GW), lambda i: (0, 0)),
            pl.BlockSpec((1, GW), lambda i: (0, 0)),
            pl.BlockSpec((hidden, GW), lambda i: (0, 0)),
            pl.BlockSpec((1, GW), lambda i: (0, 0)),
            pl.BlockSpec((hidden, OW), lambda i: (0, 0)),
            pl.BlockSpec((1, OW), lambda i: (0, 0)),
        ],
        out_specs=pl.BlockSpec((TN, OW), lambda i: (i, 0)),
        scratch_shapes=[pltpu.VMEM((S, TN, GW), jnp.float32)],
        compiler_params=pltpu.CompilerParams(
            dimension_semantics=("parallel",),
            vmem_limit_bytes=vmem_limit),
    )(z, wpool, bp, wi, bi, wh, hb, wo, bo)
    return out[:N0]


# ----------------------------------------------------------------------------
# Parameter packing: fuse + zero-pad to lane-dense (128) slabs, done once.
# ----------------------------------------------------------------------------
def pack_params(raw, *, d, e, npool, h, nout, weight_dtype=jnp.float32):
    DIN = d + e
    PW = _round_up(npool, LANE)          # pooled width
    GW = _round_up(3 * h, LANE)          # gate slab width
    OW = _round_up(nout, LANE)           # output width

    wpool = jnp.zeros((DIN, PW), jnp.float32)
    wpool = wpool.at[:d, :npool].set(raw["wpf"])
    wpool = wpool.at[d:, :npool].set(raw["wpe"])
    bp = jnp.zeros((1, PW), jnp.float32).at[:, :npool].set(raw["bp"])

    wi = jnp.zeros((PW, GW), jnp.float32)
    wi = wi.at[:npool, 0:h].set(raw["wir"])
    wi = wi.at[:npool, h:2 * h].set(raw["wiz"])
    wi = wi.at[:npool, 2 * h:3 * h].set(raw["win"])
    bi = jnp.zeros((1, GW), jnp.float32)
    bi = bi.at[:, 0:h].set(raw["br"])          # b_ir + b_hr (combined)
    bi = bi.at[:, h:2 * h].set(raw["bz"])      # b_iz + b_hz (combined)
    bi = bi.at[:, 2 * h:3 * h].set(raw["bin"])

    wh = jnp.zeros((h, GW), jnp.float32)
    wh = wh.at[:, 0:h].set(raw["whr"])
    wh = wh.at[:, h:2 * h].set(raw["whz"])
    wh = wh.at[:, 2 * h:3 * h].set(raw["whn"])
    hb = jnp.zeros((1, GW), jnp.float32).at[:, 2 * h:3 * h].set(raw["bhn"])

    wo = jnp.zeros((h, OW), jnp.float32).at[:, :nout].set(raw["wo"])
    bo = jnp.zeros((1, OW), jnp.float32).at[:, :nout].set(raw["bo"])

    # Optionally store the weight slabs narrow (bf16 halves weight DMA on
    # v6e/v7x; keep f32 on v5e / when validating against an f32 reference).
    wpool = wpool.astype(weight_dtype)
    wi = wi.astype(weight_dtype)
    wh = wh.astype(weight_dtype)
    wo = wo.astype(weight_dtype)

    return dict(wpool=wpool, bp=bp, wi=wi, bi=bi, wh=wh, hb=hb, wo=wo, bo=bo,
                dims=dict(d=d, e=e, npool=npool, h=h, nout=nout,
                          din=DIN, pw=PW, gw=GW, ow=OW))


# ----------------------------------------------------------------------------
# TemporalPooler forward (glue in plain JAX, hot paths in Pallas)
# ----------------------------------------------------------------------------
def temporal_pooler_forward(features, embeddings, packed, stride, *,
                            tile_n=256, tile_rows=1024):
    # features: (S, B, P, D)   embeddings: (S, B, P, E)
    dims = packed["dims"]
    assert stride == -1 or 1 <= stride <= features.shape[0] - 1
    if stride != -1:
        seq = features[::stride]
        emb = embeddings[::stride]
    else:
        seq = features[-1:]
        emb = embeddings[-1:]
    s, b, p, d = seq.shape
    e = emb.shape[-1]
    n = b * p

    # Per-(time, batch) mean over the people axis, broadcast per person and
    # concatenated onto the features -> one dense row matmul in the kernel.
    # TODO(synk): fold the (tiny) mean_emb @ wpe term in-kernel per group to
    #             avoid materializing the broadcast mean in HBM.
    mean_emb = jnp.mean(emb, axis=2, keepdims=True)              # (s, b, 1, e)
    mean_rep = jnp.broadcast_to(mean_emb, (s, b, p, e))
    z = jnp.concatenate([seq, mean_rep], axis=-1).reshape(s, n, d + e)

    if stride == -1:
        # No encoder: pool-only kernel, return (1, b*p, NPOOL).
        pooled = social_pool(z.reshape(s * n, d + e), packed["wpool"],
                             packed["bp"], tile_rows=tile_rows)
        return pooled.reshape(s, n, -1)[:, :, :dims["npool"]]

    out = fused_encode(z, packed["wpool"], packed["bp"], packed["wi"],
                       packed["bi"], packed["wh"], packed["hb"],
                       packed["wo"], packed["bo"], hidden=dims["h"],
                       tile_n=tile_n)                            # (n, OW)
    return out[None, :, :dims["nout"]]                           # (1, b*p, NOUT)


# ----------------------------------------------------------------------------
# Pure-JAX reference for numerical validation (unfused, unpadded params)
# ----------------------------------------------------------------------------
def reference(features, embeddings, params, stride):
    seq = features[::stride] if stride != -1 else features[-1:]
    emb = embeddings[::stride] if stride != -1 else embeddings[-1:]
    s, b, p, d = seq.shape
    seq2 = seq.reshape(s * b, p, d)
    emb2 = emb.reshape(s * b, p, -1)
    mean_emb = emb2.mean(axis=1, keepdims=True)
    pooled = jax.nn.relu(seq2 @ params["wpf"] + mean_emb @ params["wpe"]
                         + params["bp"])
    pooled = pooled.reshape(s, b * p, -1)
    if stride == -1:
        return pooled
    N = b * p
    H = params["whr"].shape[0]
    h = jnp.zeros((N, H), jnp.float32)
    for t in range(s):
        x = pooled[t]
        r = jax.nn.sigmoid(x @ params["wir"] + h @ params["whr"] + params["br"])
        zg = jax.nn.sigmoid(x @ params["wiz"] + h @ params["whz"] + params["bz"])
        nn_ = jnp.tanh(x @ params["win"] + params["bin"]
                       + r * (h @ params["whn"] + params["bhn"]))
        h = (1.0 - zg) * nn_ + zg * h
    return (h @ params["wo"] + params["bo"])[None]


# ----------------------------------------------------------------------------
if __name__ == "__main__":
    # Small shapes consistent with the module's forward.
    S, B, P = 8, 2, 4          # seq_len, batch, npeople
    D, E = 6, 8                # data_dim, embedding_dim
    NPOOL = 16                 # pooler.nout  == GRU ninp
    H = 32                     # encoder nhid
    NOUT = 16                  # encoder nout
    STRIDE = 2

    key = jax.random.PRNGKey(0)
    ks = jax.random.split(key, 20)
    rnd = lambda k, *shape: (0.1 * jax.random.normal(k, shape)).astype(jnp.float32)

    raw = {
        # synthetic SocialPooler
        "wpf": rnd(ks[0], D, NPOOL),
        "wpe": rnd(ks[1], E, NPOOL),
        "bp":  rnd(ks[2], 1, NPOOL),
        # GRU (right-multiply layout: x @ W); br/bz are combined b_i*+b_h*
        "wir": rnd(ks[3], NPOOL, H), "wiz": rnd(ks[4], NPOOL, H), "win": rnd(ks[5], NPOOL, H),
        "whr": rnd(ks[6], H, H),     "whz": rnd(ks[7], H, H),     "whn": rnd(ks[8], H, H),
        "br":  rnd(ks[9], 1, H),  "bz": rnd(ks[10], 1, H),
        "bin": rnd(ks[11], 1, H), "bhn": rnd(ks[12], 1, H),
        # hid_linear
        "wo": rnd(ks[13], H, NOUT),
        "bo": rnd(ks[14], 1, NOUT),
    }

    features = jax.random.normal(ks[15], (S, B, P, D), jnp.float32)
    embeddings = jax.random.normal(ks[16], (S, B, P, E), jnp.float32)

    # weight_dtype=jnp.bfloat16 is a drop-in DMA saving on v6e/v7x; keep f32
    # here so the numerical check against the f32 reference stays tight.
    packed = pack_params(raw, d=D, e=E, npool=NPOOL, h=H, nout=NOUT,
                         weight_dtype=jnp.float32)

    # Main path: strided pooling followed by the GRU encoder + hid_linear
    # (single fused kernel, xg never leaves VMEM).
    out = temporal_pooler_forward(features, embeddings, packed, STRIDE)
    out = jax.block_until_ready(out)
    ref = jax.block_until_ready(reference(features, embeddings, raw, STRIDE))
    assert out.shape == (1, B * P, NOUT), out.shape
    np.testing.assert_allclose(np.asarray(out), np.asarray(ref),
                               rtol=2e-3, atol=2e-3)

    # stride == -1 path: pooling at the last time step only (no encoder).
    out2 = jax.block_until_ready(
        temporal_pooler_forward(features, embeddings, packed, -1))
    ref2 = jax.block_until_ready(reference(features, embeddings, raw, -1))
    assert out2.shape == (1, B * P, NPOOL), out2.shape
    np.testing.assert_allclose(np.asarray(out2), np.asarray(ref2),
                               rtol=2e-3, atol=2e-3)

    print("KERNEL_OK")
</pallas_src>

<mosaic_0001>
module attributes {stable_mosaic.version = 11 : i64} {
  func.func @fused_pool_gru_kernel(%arg0: i32, %arg1: memref<4x8x14xf32, #tpu.memory_space<vmem>>, %arg2: memref<14x128xf32, #tpu.memory_space<vmem>>, %arg3: memref<1x128xf32, #tpu.memory_space<vmem>>, %arg4: memref<128x128xf32, #tpu.memory_space<vmem>>, %arg5: memref<1x128xf32, #tpu.memory_space<vmem>>, %arg6: memref<32x128xf32, #tpu.memory_space<vmem>>, %arg7: memref<1x128xf32, #tpu.memory_space<vmem>>, %arg8: memref<32x128xf32, #tpu.memory_space<vmem>>, %arg9: memref<1x128xf32, #tpu.memory_space<vmem>>, %arg10: memref<8x128xf32, #tpu.memory_space<vmem>>, %arg11: memref<4x8x128xf32, #tpu.memory_space<vmem>>) attributes {dimension_semantics = [#tpu.dimension_semantics<parallel>], iteration_bounds = array<i64: 1>, scalar_prefetch = 0 : i64, scratch_operands = 1 : i64, tpu.core_type = #tpu.core_type<tc>, window_params = [{transform_indices = @transform_0, window_bounds = array<i64: 4, 8, 14>}, {pipeline_mode = #tpu.pipeline_mode<synchronous>, transform_indices = @transform_1, window_bounds = array<i64: 14, 128>}, {pipeline_mode = #tpu.pipeline_mode<synchronous>, transform_indices = @transform_2, window_bounds = array<i64: 1, 128>}, {pipeline_mode = #tpu.pipeline_mode<synchronous>, transform_indices = @transform_3, window_bounds = array<i64: 128, 128>}, {pipeline_mode = #tpu.pipeline_mode<synchronous>, transform_indices = @transform_4, window_bounds = array<i64: 1, 128>}, {pipeline_mode = #tpu.pipeline_mode<synchronous>, transform_indices = @transform_5, window_bounds = array<i64: 32, 128>}, {pipeline_mode = #tpu.pipeline_mode<synchronous>, transform_indices = @transform_6, window_bounds = array<i64: 1, 128>}, {pipeline_mode = #tpu.pipeline_mode<synchronous>, transform_indices = @transform_7, window_bounds = array<i64: 32, 128>}, {pipeline_mode = #tpu.pipeline_mode<synchronous>, transform_indices = @transform_8, window_bounds = array<i64: 1, 128>}, {transform_indices = @transform_9, window_bounds = array<i64: 8, 128>}]} {
    %c0 = arith.constant 0 : index
    %c0_0 = arith.constant 0 : index
    %0 = vector.load %arg2[%c0, %c0_0] : memref<14x128xf32, #tpu.memory_space<vmem>>, vector<14x128xf32>
    %c0_1 = arith.constant 0 : index
    %c0_2 = arith.constant 0 : index
    %1 = vector.load %arg3[%c0_1, %c0_2] : memref<1x128xf32, #tpu.memory_space<vmem>>, vector<1x128xf32>
    %c0_3 = arith.constant 0 : index
    %c0_4 = arith.constant 0 : index
    %2 = vector.load %arg4[%c0_3, %c0_4] : memref<128x128xf32, #tpu.memory_space<vmem>>, vector<128x128xf32>
    %c0_5 = arith.constant 0 : index
    %c0_6 = arith.constant 0 : index
    %3 = vector.load %arg5[%c0_5, %c0_6] : memref<1x128xf32, #tpu.memory_space<vmem>>, vector<1x128xf32>
    %c0_i32 = arith.constant 0 : i32
    %4 = arith.index_cast %c0_i32 : i32 to index
    %c0_7 = arith.constant 0 : index
    %c0_8 = arith.constant 0 : index
    %5 = vector.load %arg1[%4, %c0_7, %c0_8] : memref<4x8x14xf32, #tpu.memory_space<vmem>>, vector<1x8x14xf32>
    %6 = vector.shape_cast %5 : vector<1x8x14xf32> to vector<8x14xf32>
    %cst = arith.constant dense<0.000000e+00> : vector<8x128xf32>
    %7 = tpu.matmul %6, %0, %cst {dimension_numbers = #tpu.dot_dimension_numbers<[1], [0], [0], [1], [0, 0, 1, 1], [], []>} : vector<8x14xf32>, vector<14x128xf32>, vector<8x128xf32> -> vector<8x128xf32>
    %8 = vector.broadcast %1 : vector<1x128xf32> to vector<8x128xf32>
    %9 = arith.addf %7, %8 : vector<8x128xf32>
    %cst_9 = arith.constant 0.000000e+00 : f32
    %10 = vector.broadcast %cst_9 : f32 to vector<8x128xf32>
    %11 = arith.maximumf %9, %10 : vector<8x128xf32>
    %cst_10 = arith.constant dense<0.000000e+00> : vector<8x128xf32>
    %12 = tpu.matmul %11, %2, %cst_10 {dimension_numbers = #tpu.dot_dimension_numbers<[1], [0], [0], [1], [0, 0, 1, 1], [], []>} : vector<8x128xf32>, vector<128x128xf32>, vector<8x128xf32> -> vector<8x128xf32>
    %13 = vector.broadcast %3 : vector<1x128xf32> to vector<8x128xf32>
    %14 = arith.addf %12, %13 : vector<8x128xf32>
    %15 = arith.index_cast %c0_i32 : i32 to index
    %c0_11 = arith.constant 0 : index
    %c0_12 = arith.constant 0 : index
    %16 = vector.load %arg11[%15, %c0_11, %c0_12] : memref<4x8x128xf32, #tpu.memory_space<vmem>>, vector<1x8x128xf32>
    %17 = vector.shape_cast %16 : vector<1x8x128xf32> to vector<8x128xf32>
    %18 = vector.shape_cast %14 : vector<8x128xf32> to vector<1x8x128xf32>
    tpu.vector_store %arg11[%15, %c0_11, %c0_12], %18 {strides = array<i32>} : memref<4x8x128xf32, #tpu.memory_space<vmem>>, vector<1x8x128xf32>,
    %c1_i32 = arith.constant 1 : i32
    %19 = arith.index_cast %c1_i32 : i32 to index
    %c0_13 = arith.constant 0 : index
    %c0_14 = arith.constant 0 : index
    %20 = vector.load %arg1[%19, %c0_13, %c0_14] : memref<4x8x14xf32, #tpu.memory_space<vmem>>, vector<1x8x14xf32>
    %21 = vector.shape_cast %20 : vector<1x8x14xf32> to vector<8x14xf32>
    %cst_15 = arith.constant dense<0.000000e+00> : vector<8x128xf32>
    %22 = tpu.matmul %21, %0, %cst_15 {dimension_numbers = #tpu.dot_dimension_numbers<[1], [0], [0], [1], [0, 0, 1, 1], [], []>} : vector<8x14xf32>, vector<14x128xf32>, vector<8x128xf32> -> vector<8x128xf32>
    %23 = vector.broadcast %1 : vector<1x128xf32> to vector<8x128xf32>
    %24 = arith.addf %22, %23 : vector<8x128xf32>
    %cst_16 = arith.constant 0.000000e+00 : f32
    %25 = vector.broadcast %cst_16 : f32 to vector<8x128xf32>
    %26 = arith.maximumf %24, %25 : vector<8x128xf32>
    %cst_17 = arith.constant dense<0.000000e+00> : vector<8x128xf32>
    %27 = tpu.matmul %26, %2, %cst_17 {dimension_numbers = #tpu.dot_dimension_numbers<[1], [0], [0], [1], [0, 0, 1, 1], [], []>} : vector<8x128xf32>, vector<128x128xf32>, vector<8x128xf32> -> vector<8x128xf32>
    %28 = vector.broadcast %3 : vector<1x128xf32> to vector<8x128xf32>
    %29 = arith.addf %27, %28 : vector<8x128xf32>
    %30 = arith.index_cast %c1_i32 : i32 to index
    %c0_18 = arith.constant 0 : index
    %c0_19 = arith.constant 0 : index
    %31 = vector.load %arg11[%30, %c0_18, %c0_19] : memref<4x8x128xf32, #tpu.memory_space<vmem>>, vector<1x8x128xf32>
    %32 = vector.shape_cast %31 : vector<1x8x128xf32> to vector<8x128xf32>
    %33 = vector.shape_cast %29 : vector<8x128xf32> to vector<1x8x128xf32>
    tpu.vector_store %arg11[%30, %c0_18, %c0_19], %33 {strides = array<i32>} : memref<4x8x128xf32, #tpu.memory_space<vmem>>, vector<1x8x128xf32>,
    %c2_i32 = arith.constant 2 : i32
    %34 = arith.index_cast %c2_i32 : i32 to index
    %c0_20 = arith.constant 0 : index
    %c0_21 = arith.constant 0 : index
    %35 = vector.load %arg1[%34, %c0_20, %c0_21] : memref<4x8x14xf32, #tpu.memory_space<vmem>>, vector<1x8x14xf32>
    %36 = vector.shape_cast %35 : vector<1x8x14xf32> to vector<8x14xf32>
    %cst_22 = arith.constant dense<0.000000e+00> : vector<8x128xf32>
    %37 = tpu.matmul %36, %0, %cst_22 {dimension_numbers = #tpu.dot_dimension_numbers<[1], [0], [0], [1], [0, 0, 1, 1], [], []>} : vector<8x14xf32>, vector<14x128xf32>, vector<8x128xf32> -> vector<8x128xf32>
    %38 = vector.broadcast %1 : vector<1x128xf32> to vector<8x128xf32>
    %39 = arith.addf %37, %38 : vector<8x128xf32>
    %cst_23 = arith.constant 0.000000e+00 : f32
    %40 = vector.broadcast %cst_23 : f32 to vector<8x128xf32>
    %41 = arith.maximumf %39, %40 : vector<8x128xf32>
    %cst_24 = arith.constant dense<0.000000e+00> : vector<8x128xf32>
    %42 = tpu.matmul %41, %2, %cst_24 {dimension_numbers = #tpu.dot_dimension_numbers<[1], [0], [0], [1], [0, 0, 1, 1], [], []>} : vector<8x128xf32>, vector<128x128xf32>, vector<8x128xf32> -> vector<8x128xf32>
    %43 = vector.broadcast %3 : vector<1x128xf32> to vector<8x128xf32>
    %44 = arith.addf %42, %43 : vector<8x128xf32>
    %45 = arith.index_cast %c2_i32 : i32 to index
    %c0_25 = arith.constant 0 : index
    %c0_26 = arith.constant 0 : index
    %46 = vector.load %arg11[%45, %c0_25, %c0_26] : memref<4x8x128xf32, #tpu.memory_space<vmem>>, vector<1x8x128xf32>
    %47 = vector.shape_cast %46 : vector<1x8x128xf32> to vector<8x128xf32>
    %48 = vector.shape_cast %44 : vector<8x128xf32> to vector<1x8x128xf32>
    tpu.vector_store %arg11[%45, %c0_25, %c0_26], %48 {strides = array<i32>} : memref<4x8x128xf32, #tpu.memory_space<vmem>>, vector<1x8x128xf32>,
    %c3_i32 = arith.constant 3 : i32
    %49 = arith.index_cast %c3_i32 : i32 to index
    %c0_27 = arith.constant 0 : index
    %c0_28 = arith.constant 0 : index
    %50 = vector.load %arg1[%49, %c0_27, %c0_28] : memref<4x8x14xf32, #tpu.memory_space<vmem>>, vector<1x8x14xf32>
    %51 = vector.shape_cast %50 : vector<1x8x14xf32> to vector<8x14xf32>
    %cst_29 = arith.constant dense<0.000000e+00> : vector<8x128xf32>
    %52 = tpu.matmul %51, %0, %cst_29 {dimension_numbers = #tpu.dot_dimension_numbers<[1], [0], [0], [1], [0, 0, 1, 1], [], []>} : vector<8x14xf32>, vector<14x128xf32>, vector<8x128xf32> -> vector<8x128xf32>
    %53 = vector.broadcast %1 : vector<1x128xf32> to vector<8x128xf32>
    %54 = arith.addf %52, %53 : vector<8x128xf32>
    %cst_30 = arith.constant 0.000000e+00 : f32
    %55 = vector.broadcast %cst_30 : f32 to vector<8x128xf32>
    %56 = arith.maximumf %54, %55 : vector<8x128xf32>
    %cst_31 = arith.constant dense<0.000000e+00> : vector<8x128xf32>
    %57 = tpu.matmul %56, %2, %cst_31 {dimension_numbers = #tpu.dot_dimension_numbers<[1], [0], [0], [1], [0, 0, 1, 1], [], []>} : vector<8x128xf32>, vector<128x128xf32>, vector<8x128xf32> -> vector<8x128xf32>
    %58 = vector.broadcast %3 : vector<1x128xf32> to vector<8x128xf32>
    %59 = arith.addf %57, %58 : vector<8x128xf32>
    %60 = arith.index_cast %c3_i32 : i32 to index
    %c0_32 = arith.constant 0 : index
    %c0_33 = arith.constant 0 : index
    %61 = vector.load %arg11[%60, %c0_32, %c0_33] : memref<4x8x128xf32, #tpu.memory_space<vmem>>, vector<1x8x128xf32>
    %62 = vector.shape_cast %61 : vector<1x8x128xf32> to vector<8x128xf32>
    %63 = vector.shape_cast %59 : vector<8x128xf32> to vector<1x8x128xf32>
    tpu.vector_store %arg11[%60, %c0_32, %c0_33], %63 {strides = array<i32>} : memref<4x8x128xf32, #tpu.memory_space<vmem>>, vector<1x8x128xf32>,
    %c4_i32 = arith.constant 4 : i32
    %c0_34 = arith.constant 0 : index
    %c0_35 = arith.constant 0 : index
    %64 = vector.load %arg6[%c0_34, %c0_35] : memref<32x128xf32, #tpu.memory_space<vmem>>, vector<32x128xf32>
    %c0_36 = arith.constant 0 : index
    %c0_37 = arith.constant 0 : index
    %65 = vector.load %arg7[%c0_36, %c0_37] : memref<1x128xf32, #tpu.memory_space<vmem>>, vector<1x128xf32>
    %cst_38 = arith.constant 0.000000e+00 : f32
    %66 = vector.broadcast %cst_38 : f32 to vector<8x32xf32>
    %c0_i32_39 = arith.constant 0 : i32
    %67 = arith.index_cast %c0_i32_39 : i32 to index
    %c0_40 = arith.constant 0 : index
    %c0_41 = arith.constant 0 : index
    %68 = vector.load %arg11[%67, %c0_40, %c0_41] : memref<4x8x128xf32, #tpu.memory_space<vmem>>, vector<1x8x128xf32>
    %69 = vector.shape_cast %68 : vector<1x8x128xf32> to vector<8x128xf32>
    %cst_42 = arith.constant dense<0.000000e+00> : vector<8x128xf32>
    %70 = tpu.matmul %66, %64, %cst_42 {dimension_numbers = #tpu.dot_dimension_numbers<[1], [0], [0], [1], [0, 0, 1, 1], [], []>} : vector<8x32xf32>, vector<32x128xf32>, vector<8x128xf32> -> vector<8x128xf32>
    %71 = vector.broadcast %65 : vector<1x128xf32> to vector<8x128xf32>
    %72 = arith.addf %70, %71 : vector<8x128xf32>
    %73 = vector.extract_strided_slice %69 {offsets = [0, 0], sizes = [8, 64], strides = [1, 1]} : vector<8x128xf32> to vector<8x64xf32>
    %74 = vector.extract_strided_slice %72 {offsets = [0, 0], sizes = [8, 64], strides = [1, 1]} : vector<8x128xf32> to vector<8x64xf32>
    %75 = arith.addf %73, %74 : vector<8x64xf32>
    %76 = arith.negf %75 : vector<8x64xf32>
    %77 = math.exp %76 : vector<8x64xf32>
    %cst_43 = arith.constant 1.000000e+00 : f32
    %78 = vector.broadcast %cst_43 : f32 to vector<8x64xf32>
    %79 = arith.addf %78, %77 : vector<8x64xf32>
    %80 = arith.divf %78, %79 : vector<8x64xf32>
    %81 = vector.extract_strided_slice %80 {offsets = [0, 0], sizes = [8, 32], strides = [1, 1]} : vector<8x64xf32> to vector<8x32xf32>
    %82 = vector.extract_strided_slice %80 {offsets = [0, 32], sizes = [8, 32], strides = [1, 1]} : vector<8x64xf32> to vector<8x32xf32>
    %83 = vector.extract_strided_slice %69 {offsets = [0, 64], sizes = [8, 32], strides = [1, 1]} : vector<8x128xf32> to vector<8x32xf32>
    %84 = vector.extract_strided_slice %72 {offsets = [0, 64], sizes = [8, 32], strides = [1, 1]} : vector<8x128xf32> to vector<8x32xf32>
    %85 = arith.mulf %81, %84 : vector<8x32xf32>
    %86 = arith.addf %83, %85 : vector<8x32xf32>
    %87 = math.tanh %86 : vector<8x32xf32>
    %cst_44 = arith.constant 1.000000e+00 : f32
    %88 = vector.broadcast %cst_44 : f32 to vector<8x32xf32>
    %89 = arith.subf %88, %82 : vector<8x32xf32>
    %90 = arith.mulf %89, %87 : vector<8x32xf32>
    %91 = arith.mulf %82, %66 : vector<8x32xf32>
    %92 = arith.addf %90, %91 : vector<8x32xf32>
    %c1_i32_45 = arith.constant 1 : i32
    %93 = arith.index_cast %c1_i32_45 : i32 to index
    %c0_46 = arith.constant 0 : index
    %c0_47 = arith.constant 0 : index
    %94 = vector.load %arg11[%93, %c0_46, %c0_47] : memref<4x8x128xf32, #tpu.memory_space<vmem>>, vector<1x8x128xf32>
    %95 = vector.shape_cast %94 : vector<1x8x128xf32> to vector<8x128xf32>
    %cst_48 = arith.constant dense<0.000000e+00> : vector<8x128xf32>
    %96 = tpu.matmul %92, %64, %cst_48 {dimension_numbers = #tpu.dot_dimension_numbers<[1], [0], [0], [1], [0, 0, 1, 1], [], []>} : vector<8x32xf32>, vector<32x128xf32>, vector<8x128xf32> -> vector<8x128xf32>
    %97 = vector.broadcast %65 : vector<1x128xf32> to vector<8x128xf32>
    %98 = arith.addf %96, %97 : vector<8x128xf32>
    %99 = vector.extract_strided_slice %95 {offsets = [0, 0], sizes = [8, 64], strides = [1, 1]} : vector<8x128xf32> to vector<8x64xf32>
    %100 = vector.extract_strided_slice %98 {offsets = [0, 0], sizes = [8, 64], strides = [1, 1]} : vector<8x128xf32> to vector<8x64xf32>
    %101 = arith.addf %99, %100 : vector<8x64xf32>
    %102 = arith.negf %101 : vector<8x64xf32>
    %103 = math.exp %102 : vector<8x64xf32>
    %cst_49 = arith.constant 1.000000e+00 : f32
    %104 = vector.broadcast %cst_49 : f32 to vector<8x64xf32>
    %105 = arith.addf %104, %103 : vector<8x64xf32>
    %106 = arith.divf %104, %105 : vector<8x64xf32>
    %107 = vector.extract_strided_slice %106 {offsets = [0, 0], sizes = [8, 32], strides = [1, 1]} : vector<8x64xf32> to vector<8x32xf32>
    %108 = vector.extract_strided_slice %106 {offsets = [0, 32], sizes = [8, 32], strides = [1, 1]} : vector<8x64xf32> to vector<8x32xf32>
    %109 = vector.extract_strided_slice %95 {offsets = [0, 64], sizes = [8, 32], strides = [1, 1]} : vector<8x128xf32> to vector<8x32xf32>
    %110 = vector.extract_strided_slice %98 {offsets = [0, 64], sizes = [8, 32], strides = [1, 1]} : vector<8x128xf32> to vector<8x32xf32>
    %111 = arith.mulf %107, %110 : vector<8x32xf32>
    %112 = arith.addf %109, %111 : vector<8x32xf32>
    %113 = math.tanh %112 : vector<8x32xf32>
    %cst_50 = arith.constant 1.000000e+00 : f32
    %114 = vector.broadcast %cst_50 : f32 to vector<8x32xf32>
    %115 = arith.subf %114, %108 : vector<8x32xf32>
    %116 = arith.mulf %115, %113 : vector<8x32xf32>
    %117 = arith.mulf %108, %92 : vector<8x32xf32>
    %118 = arith.addf %116, %117 : vector<8x32xf32>
    %c2_i32_51 = arith.constant 2 : i32
    %119 = arith.index_cast %c2_i32_51 : i32 to index
    %c0_52 = arith.constant 0 : index
    %c0_53 = arith.constant 0 : index
    %120 = vector.load %arg11[%119, %c0_52, %c0_53] : memref<4x8x128xf32, #tpu.memory_space<vmem>>, vector<1x8x128xf32>
    %121 = vector.shape_cast %120 : vector<1x8x128xf32> to vector<8x128xf32>
    %cst_54 = arith.constant dense<0.000000e+00> : vector<8x128xf32>
    %122 = tpu.matmul %118, %64, %cst_54 {dimension_numbers = #tpu.dot_dimension_numbers<[1], [0], [0], [1], [0, 0, 1, 1], [], []>} : vector<8x32xf32>, vector<32x128xf32>, vector<8x128xf32> -> vector<8x128xf32>
    %123 = vector.broadcast %65 : vector<1x128xf32> to vector<8x128xf32>
    %124 = arith.addf %122, %123 : vector<8x128xf32>
    %125 = vector.extract_strided_slice %121 {offsets = [0, 0], sizes = [8, 64], strides = [1, 1]} : vector<8x128xf32> to vector<8x64xf32>
    %126 = vector.extract_strided_slice %124 {offsets = [0, 0], sizes = [8, 64], strides = [1, 1]} : vector<8x128xf32> to vector<8x64xf32>
    %127 = arith.addf %125, %126 : vector<8x64xf32>
    %128 = arith.negf %127 : vector<8x64xf32>
    %129 = math.exp %128 : vector<8x64xf32>
    %cst_55 = arith.constant 1.000000e+00 : f32
    %130 = vector.broadcast %cst_55 : f32 to vector<8x64xf32>
    %131 = arith.addf %130, %129 : vector<8x64xf32>
    %132 = arith.divf %130, %131 : vector<8x64xf32>
    %133 = vector.extract_strided_slice %132 {offsets = [0, 0], sizes = [8, 32], strides = [1, 1]} : vector<8x64xf32> to vector<8x32xf32>
    %134 = vector.extract_strided_slice %132 {offsets = [0, 32], sizes = [8, 32], strides = [1, 1]} : vector<8x64xf32> to vector<8x32xf32>
    %135 = vector.extract_strided_slice %121 {offsets = [0, 64], sizes = [8, 32], strides = [1, 1]} : vector<8x128xf32> to vector<8x32xf32>
    %136 = vector.extract_strided_slice %124 {offsets = [0, 64], sizes = [8, 32], strides = [1, 1]} : vector<8x128xf32> to vector<8x32xf32>
    %137 = arith.mulf %133, %136 : vector<8x32xf32>
    %138 = arith.addf %135, %137 : vector<8x32xf32>
    %139 = math.tanh %138 : vector<8x32xf32>
    %cst_56 = arith.constant 1.000000e+00 : f32
    %140 = vector.broadcast %cst_56 : f32 to vector<8x32xf32>
    %141 = arith.subf %140, %134 : vector<8x32xf32>
    %142 = arith.mulf %141, %139 : vector<8x32xf32>
    %143 = arith.mulf %134, %118 : vector<8x32xf32>
    %144 = arith.addf %142, %143 : vector<8x32xf32>
    %c3_i32_57 = arith.constant 3 : i32
    %145 = arith.index_cast %c3_i32_57 : i32 to index
    %c0_58 = arith.constant 0 : index
    %c0_59 = arith.constant 0 : index
    %146 = vector.load %arg11[%145, %c0_58, %c0_59] : memref<4x8x128xf32, #tpu.memory_space<vmem>>, vector<1x8x128xf32>
    %147 = vector.shape_cast %146 : vector<1x8x128xf32> to vector<8x128xf32>
    %cst_60 = arith.constant dense<0.000000e+00> : vector<8x128xf32>
    %148 = tpu.matmul %144, %64, %cst_60 {dimension_numbers = #tpu.dot_dimension_numbers<[1], [0], [0], [1], [0, 0, 1, 1], [], []>} : vector<8x32xf32>, vector<32x128xf32>, vector<8x128xf32> -> vector<8x128xf32>
    %149 = vector.broadcast %65 : vector<1x128xf32> to vector<8x128xf32>
    %150 = arith.addf %148, %149 : vector<8x128xf32>
    %151 = vector.extract_strided_slice %147 {offsets = [0, 0], sizes = [8, 64], strides = [1, 1]} : vector<8x128xf32> to vector<8x64xf32>
    %152 = vector.extract_strided_slice %150 {offsets = [0, 0], sizes = [8, 64], strides = [1, 1]} : vector<8x128xf32> to vector<8x64xf32>
    %153 = arith.addf %151, %152 : vector<8x64xf32>
    %154 = arith.negf %153 : vector<8x64xf32>
    %155 = math.exp %154 : vector<8x64xf32>
    %cst_61 = arith.constant 1.000000e+00 : f32
    %156 = vector.broadcast %cst_61 : f32 to vector<8x64xf32>
    %157 = arith.addf %156, %155 : vector<8x64xf32>
    %158 = arith.divf %156, %157 : vector<8x64xf32>
    %159 = vector.extract_strided_slice %158 {offsets = [0, 0], sizes = [8, 32], strides = [1, 1]} : vector<8x64xf32> to vector<8x32xf32>
    %160 = vector.extract_strided_slice %158 {offsets = [0, 32], sizes = [8, 32], strides = [1, 1]} : vector<8x64xf32> to vector<8x32xf32>
    %161 = vector.extract_strided_slice %147 {offsets = [0, 64], sizes = [8, 32], strides = [1, 1]} : vector<8x128xf32> to vector<8x32xf32>
    %162 = vector.extract_strided_slice %150 {offsets = [0, 64], sizes = [8, 32], strides = [1, 1]} : vector<8x128xf32> to vector<8x32xf32>
    %163 = arith.mulf %159, %162 : vector<8x32xf32>
    %164 = arith.addf %161, %163 : vector<8x32xf32>
    %165 = math.tanh %164 : vector<8x32xf32>
    %cst_62 = arith.constant 1.000000e+00 : f32
    %166 = vector.broadcast %cst_62 : f32 to vector<8x32xf32>
    %167 = arith.subf %166, %160 : vector<8x32xf32>
    %168 = arith.mulf %167, %165 : vector<8x32xf32>
    %169 = arith.mulf %160, %144 : vector<8x32xf32>
    %170 = arith.addf %168, %169 : vector<8x32xf32>
    %c4_i32_63 = arith.constant 4 : i32
    %c0_64 = arith.constant 0 : index
    %c0_65 = arith.constant 0 : index
    %171 = vector.load %arg8[%c0_64, %c0_65] : memref<32x128xf32, #tpu.memory_space<vmem>>, vector<32x128xf32>
    %cst_66 = arith.constant dense<0.000000e+00> : vector<8x128xf32>
    %172 = tpu.matmul %170, %171, %cst_66 {dimension_numbers = #tpu.dot_dimension_numbers<[1], [0], [0], [1], [0, 0, 1, 1], [], []>} : vector<8x32xf32>, vector<32x128xf32>, vector<8x128xf32> -> vector<8x128xf32>
    %c0_67 = arith.constant 0 : index
    %c0_68 = arith.constant 0 : index
    %173 = vector.load %arg9[%c0_67, %c0_68] : memref<1x128xf32, #tpu.memory_space<vmem>>, vector<1x128xf32>
    %174 = vector.broadcast %173 : vector<1x128xf32> to vector<8x128xf32>
    %175 = arith.addf %172, %174 : vector<8x128xf32>
    %c0_69 = arith.constant 0 : index
    %c0_70 = arith.constant 0 : index
    %176 = vector.load %arg10[%c0_69, %c0_70] : memref<8x128xf32, #tpu.memory_space<vmem>>, vector<8x128xf32>
    tpu.vector_store %arg10[%c0_69, %c0_70], %175 {strides = array<i32>} : memref<8x128xf32, #tpu.memory_space<vmem>>, vector<8x128xf32>,
    return
  }
  func.func @transform_0(%arg0: i32) -> (i32, i32, i32) {
    %c0_i32 = arith.constant 0 : i32
    %c0_i32_0 = arith.constant 0 : i32
    %c0_i32_1 = arith.constant 0 : i32
    return %c0_i32, %arg0, %c0_i32_0 : i32, i32, i32
  }
  func.func @transform_1(%arg0: i32) -> (i32, i32) {
    %c0_i32 = arith.constant 0 : i32
    %c0_i32_0 = arith.constant 0 : i32
    %c0_i32_1 = arith.constant 0 : i32
    return %c0_i32, %c0_i32_0 : i32, i32
  }
  func.func @transform_2(%arg0: i32) -> (i32, i32) {
    %c0_i32 = arith.constant 0 : i32
    %c0_i32_0 = arith.constant 0 : i32
    %c0_i32_1 = arith.constant 0 : i32
    return %c0_i32, %c0_i32_0 : i32, i32
  }
  func.func @transform_3(%arg0: i32) -> (i32, i32) {
    %c0_i32 = arith.constant 0 : i32
    %c0_i32_0 = arith.constant 0 : i32
    %c0_i32_1 = arith.constant 0 : i32
    return %c0_i32, %c0_i32_0 : i32, i32
  }
  func.func @transform_4(%arg0: i32) -> (i32, i32) {
    %c0_i32 = arith.constant 0 : i32
    %c0_i32_0 = arith.constant 0 : i32
    %c0_i32_1 = arith.constant 0 : i32
    return %c0_i32, %c0_i32_0 : i32, i32
  }
  func.func @transform_5(%arg0: i32) -> (i32, i32) {
    %c0_i32 = arith.constant 0 : i32
    %c0_i32_0 = arith.constant 0 : i32
    %c0_i32_1 = arith.constant 0 : i32
    return %c0_i32, %c0_i32_0 : i32, i32
  }
  func.func @transform_6(%arg0: i32) -> (i32, i32) {
    %c0_i32 = arith.constant 0 : i32
    %c0_i32_0 = arith.constant 0 : i32
    %c0_i32_1 = arith.constant 0 : i32
    return %c0_i32, %c0_i32_0 : i32, i32
  }
  func.func @transform_7(%arg0: i32) -> (i32, i32) {
    %c0_i32 = arith.constant 0 : i32
    %c0_i32_0 = arith.constant 0 : i32
    %c0_i32_1 = arith.constant 0 : i32
    return %c0_i32, %c0_i32_0 : i32, i32
  }
  func.func @transform_8(%arg0: i32) -> (i32, i32) {
    %c0_i32 = arith.constant 0 : i32
    %c0_i32_0 = arith.constant 0 : i32
    %c0_i32_1 = arith.constant 0 : i32
    return %c0_i32, %c0_i32_0 : i32, i32
  }
  func.func @transform_9(%arg0: i32) -> (i32, i32) {
    %c0_i32 = arith.constant 0 : i32
    %c0_i32_0 = arith.constant 0 : i32
    return %arg0, %c0_i32 : i32, i32
  }
}

</mosaic_0001>

<bundles_post_ra>
// kernel: tpu_custom_call.1
= control target key start
LH: loop header
LB: loop body
LE: loop exit
PB: predicated region body
PF: predicated region fallthrough
CT: control target
= control target key end

     0   :  { %14 = vsyncpa [#allocation4], 0  ;;  %s2180_s0 = inlined_call_operand.hbm [shape: f32[4,8,14], index: 0, kind: input, shape index: {}]   ;;  %s2181_s1 = inlined_call_operand.hbm [shape: f32[14,128], index: 1, kind: input, shape index: {}]   ;;  %s2182_s2 = inlined_call_operand.vmem [shape: f32[1,128], index: 2, kind: input, shape index: {}]   ;;  %s2183_s3 = inlined_call_operand.hbm [shape: f32[128,128], index: 3, kind: input, shape index: {}]   ;;  %s2184_s4 = inlined_call_operand.vmem [shape: f32[1,128], index: 4, kind: input, shape index: {}]   ;;  %s2185_s5 = inlined_call_operand.hbm [shape: f32[32,128], index: 5, kind: input, shape index: {}]   ;;  %s2186_s6 = inlined_call_operand.vmem [shape: f32[1,128], index: 6, kind: input, shape index: {}]   ;;  %s2187_s7 = inlined_call_operand.hbm [shape: f32[32,128], index: 7, kind: input, shape index: {}]   ;;  %s2188_s8 = inlined_call_operand.vmem [shape: f32[1,128], index: 8, kind: input, shape index: {}]   ;;  %s2189_s9 = inlined_call_operand.hbm [shape: f32[8,128], index: 9, kind: output, shape index: {}]  }
   0x1   :  { %15 = vsyncpa [#allocation7], 0 }
   0x2   :  { %16 = vsyncpa [#allocation10], 0 }
   0x3   :  { %17 = vsyncpa [#allocation5], 0  ;;  %s1762_s30 = smov [#allocation6]   ;;  %s1763_s11 = smov [#allocation9]  }
   0x4   :  { %s35_s10 = sshll.u32 %s1762_s30, 4  ;;  %s63_s12 = sshll.u32 %s1763_s11, 4  ;;  %s36_s10 = int_to_ptr.vmem [resolvable:$true] %s35_s10  ;;  %s64_s12 = int_to_ptr.vmem [resolvable:$true] %s63_s12 }
   0x5   :  { %s1642_s13 = scalar_lea.vmem %s36_s10, 256  ;;  %p1647_p1 = scmp.lt.s32.totalorder %s36_s10, %s36_s10 }
   0x6   :  { %p1643_p0 = scmp.ne.s32.totalorder %s36_s10, %s1642_s13  ;;  %p1648_p2 = scmp.lt.s32.totalorder %s1642_s13, %s1642_s13 }
   0x8   :  { %p1649_p3 = por %p1648_p2, %p1647_p1 }
   0xa   :  { %p1650_p4 = pnand %p1649_p3, %p1643_p0 }
   0xc   :  { %1653 = shalt.err (!%p1650_p4)
}
   0xd   :  { %s1764_s14 = smov 128   ;;  %s1765_s15 = smov 8  }
   0xe   :  { %41 = dma.hbm_to_vmem [thread:$0]  %s2181_s1, 256, %s36_s10, [#allocation7], %s1764_s14, %s1764_s14, %s1765_s15  }
   0xf   :  { %s1662_s18 = scalar_lea.vmem %s64_s12, 512  ;;  %p1667_p6 = scmp.lt.s32.totalorder %s64_s12, %s64_s12 }
  0x10   :  { %p1663_p5 = scmp.ne.s32.totalorder %s64_s12, %s1662_s18  ;;  %p1668_p7 = scmp.lt.s32.totalorder %s1662_s18, %s1662_s18 }
  0x12   :  { %p1669_p8 = por %p1668_p7, %p1667_p6 }
  0x14   :  { %p1670_p9 = pnand %p1669_p8, %p1663_p5 }
  0x16   :  { %1673 = shalt.err (!%p1670_p9)
}
  0x17   :  { %69 = dma.hbm_to_vmem [thread:$0]  %s2185_s5, 512, %s64_s12, [#allocation10], %s1764_s14, %s1764_s14, %s1765_s15  }
  0x18   :  { %s1766_s21 = smov [#allocation3]   ;;  %s1767_s23 = smov [#allocation8]  }
  0x19   :  { %s23_s22 = sshll.u32 %s1766_s21, 4  ;;  %s49_s24 = sshll.u32 %s1767_s23, 4  ;;  %s24_s22 = int_to_ptr.vmem [resolvable:$true] %s23_s22  ;;  %s50_s24 = int_to_ptr.vmem [resolvable:$true] %s49_s24 }
  0x1a   :  { %s1682_s1 = scalar_lea.vmem %s24_s22, 512  ;;  %p1687_p11 = scmp.lt.s32.totalorder %s24_s22, %s24_s22 }
  0x1b   :  { %p1683_p10 = scmp.ne.s32.totalorder %s24_s22, %s1682_s1  ;;  %p1688_p12 = scmp.lt.s32.totalorder %s1682_s1, %s1682_s1 }
  0x1d   :  { %p1689_p13 = por %p1688_p12, %p1687_p11 }
  0x1f   :  { %p1690_p0 = pnand %p1689_p13, %p1683_p10 }
  0x21   :  { %1693 = shalt.err (!%p1690_p0)
}
  0x22   :  { %29 = dma.hbm_to_vmem [thread:$0]  %s2180_s0, 512, %s24_s22, [#allocation4], %s1764_s14, %s1764_s14, %s1765_s15  }
  0x23   :  { %s1702_s5 = scalar_lea.vmem %s50_s24, 2048  ;;  %p1707_p2 = scmp.lt.s32.totalorder %s50_s24, %s50_s24 }
  0x24   :  { %p1703_p1 = scmp.ne.s32.totalorder %s50_s24, %s1702_s5  ;;  %p1708_p3 = scmp.lt.s32.totalorder %s1702_s5, %s1702_s5 }
  0x26   :  { %p1709_p4 = por %p1708_p3, %p1707_p2 }
  0x28   :  { %p1710_p5 = pnand %p1709_p4, %p1703_p1 }
  0x2a   :  { %1713 = shalt.err (!%p1710_p5)
}
  0x2b   :  { %55 = dma.hbm_to_vmem [thread:$0]  %s2183_s3, 2048, %s50_s24, [#allocation7], %s1764_s14, %s1764_s14, %s1765_s15  }
  0x2c   :  { %s1768_s29 = smov [#allocation11]  }
  0x2d   :  { %s77_s30 = sshll.u32 %s1768_s29, 4  ;;  %s78_s30 = int_to_ptr.vmem [resolvable:$true] %s77_s30 }
  0x2e   :  { %s1722_s10 = scalar_lea.vmem %s78_s30, 512  ;;  %p1727_p7 = scmp.lt.s32.totalorder %s78_s30, %s78_s30 }
  0x2f   :  { %p1723_p6 = scmp.ne.s32.totalorder %s78_s30, %s1722_s10  ;;  %p1728_p8 = scmp.lt.s32.totalorder %s1722_s10, %s1722_s10 }
  0x31   :  { %p1729_p9 = por %p1728_p8, %p1727_p7 }
  0x33   :  { %p1730_p10 = pnand %p1729_p9, %p1723_p6 }
  0x35   :  { %1733 = shalt.err (!%p1730_p10)
}
  0x36   :  { %83 = dma.hbm_to_vmem [thread:$0]  %s2187_s7, 512, %s78_s30, [#allocation10], %s1764_s14, %s1764_s14, %s1765_s15  }
  0x37   :  { %1754 = dma.done.wait [#allocation4], 512  }
  0x38   :  { %1755 = vsyncadd [#allocation4], 4294966784 }
  0x39   :  { %1756 = dma.done.wait [#allocation7], 2304  }
  0x3a   :  { %1757 = vsyncadd [#allocation7], 4294964992 }
  0x3b   :  { %1758 = dma.done.wait [#allocation10], 1024  }
  0x3c   :  { %1759 = vsyncadd [#allocation10], 4294966272  ;;  %v1769_v0 = vmov 0.0   ;;  %vm1770_vm0 = vmmov 0   ;;  %vm132_vm1 = vcmask 1045504   ;;  %v1862_v2 = vld [vmem:[#allocation6] sm:$0xff] }
  0x3d   :  { %1375 = vmatprep.subr.mxu0 %v1769_v0  ;;  %1379 = vmatprep.mubr.msk.f32.mxu0 %vm1770_vm0, %v1769_v0  ;;  %v1860_v1 = vld [vmem:[#allocation6 + $0x8] sm:$0x3f]  ;;  %v121_v3 = vld [vmem:[#allocation3] sm:$0xff]  ;;  %vm128_vm2 = vcmask 113664   ;;  %v1874_v6 = vld [vmem:[#allocation8 + $0x68] sm:$0xff]  ;;  %s1771_s13 = smov 64  }
  0x3e   :  { %1382 = vmatprep.subr.mxu1 %v1769_v0  ;;  %1414 = vmatprep.mubr.msk.f32.mxu1 %vm1770_vm0, %v1769_v0  ;;  %v1866_v4 = vld [vmem:[#allocation8 + $0x78] sm:$0xff]  ;;  %v1868_v5 = vld [vmem:[#allocation8 + $0x70] sm:$0xff]  ;;  %v1879_v7 = vld [vmem:[#allocation8 + $0x60] sm:$0xff]  ;;  %vm740_vm3 = vcmask 261120   ;;  %s1773_s17 = smov [#allocation12]  }
  0x3f   :  { %1376 = vmatpush3.msk.msra.mxu0 %vm132_vm1, %v1860_v1  ;;  %1383 = vmatpush3.msra.mxu1 %v1866_v4  ;;  %v1886_v8 = vld [vmem:[#allocation8 + $0x58] sm:$0xff]  ;;  %v1892_v9 = vld [vmem:[#allocation8 + $0x50] sm:$0xff]  ;;  %v1899_v10 = vld [vmem:[#allocation8 + $0x48] sm:$0xff]  ;;  %s1239_s18 = sshll.u32 %s1773_s17, 4  ;;  %s1240_s18 = int_to_ptr.vmem [resolvable:$true] %s1239_s18 }
  0x40   :  { %1377 = vmatprep.subr.mxu0 %v1769_v0  ;;  %1384 = vmatprep.subr.mxu1 %v1769_v0  ;;  %v1903_v11 = vld [vmem:[#allocation8 + $0x40] sm:$0xff]  ;;  %v1907_v12 = vld [vmem:[#allocation8 + $0x38] sm:$0xff]  ;;  %v1911_v13 = vld [vmem:[#allocation8 + $0x30] sm:$0xff]  ;;  %s1734_s19 = scalar_lea.vmem %s1240_s18, 128  ;;  %p1739_p12 = scmp.lt.s32.totalorder %s1240_s18, %s1240_s18 }
  0x41   :  { %1378 = vmatpush3.msra.mxu0 %v1862_v2  ;;  %1385 = vmatpush3.msra.mxu1 %v1868_v5  ;;  %v1915_v14 = vld [vmem:[#allocation8 + $0x28] sm:$0xff]  ;;  %v1919_v15 = vld [vmem:[#allocation8 + $0x20] sm:$0xff]  ;;  %v1923_v16 = vld [vmem:[#allocation8 + $0x18] sm:$0xff]  ;;  %p1735_p11 = scmp.ne.s32.totalorder %s1240_s18, %s1734_s19  ;;  %p1740_p13 = scmp.lt.s32.totalorder %s1734_s19, %s1734_s19 }
  0x42   :  { %1380 = vmatmul.mubr.msk.f32.vlgmr.msra.gmra.mxu0 %vm128_vm2, %v121_v3  ;;  %1386 = vmatprep.subr.mxu1 %v1769_v0  ;;  %v1927_v17 = vld [vmem:[#allocation8 + $0x10] sm:$0xff]  ;;  %v1933_v18 = vld [vmem:[#allocation8 + $0x8] sm:$0xff]  ;;  %v1937_v19 = vld [vmem:[#allocation8] sm:$0xff] }
  0x43   :  { %1417 = vmatprep.subr.mxu0 %v1769_v0  ;;  %1387 = vmatpush3.msra.mxu1 %v1874_v6  ;;  %v1944_v20 = vld [vmem:[%s2182_s2] ss:$0 sm:$0xff]  ;;  %v433_v25 = vld [vmem:[#allocation3 + $0x10] sm:$0xff]  ;;  %v1992_v32 = vld [vmem:[#allocation9 + $0x18] sm:$0xff]  ;;  %p1741_p0 = por %p1740_p13, %p1739_p12 }
  0x44   :  { %1418 = vmatpush3.msk.msra.mxu0 %vm132_vm1, %v1860_v1  ;;  %1388 = vmatprep.subr.mxu1 %v1769_v0  ;;  %v1994_v33 = vld [vmem:[#allocation9 + $0x10] sm:$0xff]  ;;  %v2000_v34 = vld [vmem:[#allocation9 + $0x8] sm:$0xff]  ;;  %v2004_v35 = vld [vmem:[#allocation9] sm:$0xff] }
  0x45   :  { %1419 = vmatprep.subr.mxu0 %v1769_v0  ;;  %1389 = vmatpush3.msra.mxu1 %v1879_v7  ;;  %v285_v36 = vld [vmem:[#allocation3 + $0x8] sm:$0xff]  ;;  %v2061_v39 = vld [vmem:[%s2186_s6] ss:$0 sm:$0xff]  ;;  %v581_v56 = vld [vmem:[#allocation3 + $0x18] sm:$0xff]  ;;  %p1742_p1 = pnand %p1741_p0, %p1735_p11 }
  0x46   :  { %1420 = vmatpush3.msra.mxu0 %v1862_v2  ;;  %1390 = vmatprep.subr.mxu1 %v1769_v0  ;;  %v2068_v43 = vld [vmem:[%s2184_s4] ss:$0 sm:$0xff]  ;;  %s1772_s4 = smov 96  }
  0x47   :  { %1421 = vmatprep.mubr.msk.f32.mxu0 %vm1770_vm0, %v1769_v0  ;;  %1391 = vmatpush3.msra.mxu1 %v1886_v8 }
  0x48   :  { %1424 = vmatprep.subr.mxu0 %v1769_v0  ;;  %1392 = vmatprep.subr.mxu1 %v1769_v0 }
  0x49   :  { %1393 = vmatpush3.msra.mxu1 %v1892_v9  ;;  %1422 = vmatmul.mubr.msk.f32.vlgmr.msra.gmra.mxu0 %vm128_vm2, %v285_v36 }
  0x4a   :  { %1394 = vmatprep.subr.mxu1 %v1769_v0  ;;  %1425 = vmatpush3.msra.mxu0 %v1866_v4 }
  0x4b   :  { %1395 = vmatpush3.msra.mxu1 %v1899_v10  ;;  %1456 = vmatprep.mubr.msk.f32.mxu0 %vm1770_vm0, %v1769_v0 }
  0x4c   :  { %1396 = vmatprep.subr.mxu1 %v1769_v0  ;;  %1426 = vmatprep.subr.mxu0 %v1769_v0 }
  0x4d   :  { %1397 = vmatpush3.msra.mxu1 %v1903_v11  ;;  %1427 = vmatpush3.msra.mxu0 %v1868_v5 }
  0x4e   :  { %1398 = vmatprep.subr.mxu1 %v1769_v0  ;;  %1428 = vmatprep.subr.mxu0 %v1769_v0 }
  0x4f   :  { %1399 = vmatpush3.msra.mxu1 %v1907_v12  ;;  %1429 = vmatpush3.msra.mxu0 %v1874_v6 }
  0x50   :  { %1400 = vmatprep.subr.mxu1 %v1769_v0  ;;  %1430 = vmatprep.subr.mxu0 %v1769_v0 }
  0x51   :  { %1401 = vmatpush3.msra.mxu1 %v1911_v13  ;;  %1431 = vmatpush3.msra.mxu0 %v1879_v7 }
  0x52   :  { %1402 = vmatprep.subr.mxu1 %v1769_v0  ;;  %1432 = vmatprep.subr.mxu0 %v1769_v0 }
  0x53   :  { %1403 = vmatpush3.msra.mxu1 %v1915_v14  ;;  %1433 = vmatpush3.msra.mxu0 %v1886_v8 }
  0x54   :  { %1404 = vmatprep.subr.mxu1 %v1769_v0  ;;  %1434 = vmatprep.subr.mxu0 %v1769_v0 }
  0x55   :  { %1405 = vmatpush3.msra.mxu1 %v1919_v15  ;;  %1435 = vmatpush3.msra.mxu0 %v1892_v9 }
  0x56   :  { %1406 = vmatprep.subr.mxu1 %v1769_v0  ;;  %1436 = vmatprep.subr.mxu0 %v1769_v0 }
  0x57   :  { %1407 = vmatpush3.msra.mxu1 %v1923_v16  ;;  %1437 = vmatpush3.msra.mxu0 %v1899_v10 }
  0x58   :  { %1408 = vmatprep.subr.mxu1 %v1769_v0  ;;  %1438 = vmatprep.subr.mxu0 %v1769_v0 }
  0x59   :  { %1409 = vmatpush3.msra.mxu1 %v1927_v17  ;;  %1439 = vmatpush3.msra.mxu0 %v1903_v11 }
  0x5a   :  { %1410 = vmatprep.subr.mxu1 %v1769_v0  ;;  %1440 = vmatprep.subr.mxu0 %v1769_v0 }
  0x5b   :  { %1411 = vmatpush3.msra.mxu1 %v1933_v18  ;;  %1441 = vmatpush3.msra.mxu0 %v1907_v12 }
  0x5c   :  { %1412 = vmatprep.subr.mxu1 %v1769_v0  ;;  %1442 = vmatprep.subr.mxu0 %v1769_v0 }
  0x5d   :  { %1413 = vmatpush3.msra.mxu1 %v1937_v19  ;;  %1443 = vmatpush3.msra.mxu0 %v1911_v13 }
  0x5e   :  { %1459 = vmatprep.subr.mxu1 %v1769_v0  ;;  %1444 = vmatprep.subr.mxu0 %v1769_v0 }
  0x5f   :  { %1445 = vmatpush3.msra.mxu0 %v1915_v14 }
  0x60   :  { %1446 = vmatprep.subr.mxu0 %v1769_v0 }
  0x61   :  { %1447 = vmatpush3.msra.mxu0 %v1919_v15 }
  0x62   :  { %1448 = vmatprep.subr.mxu0 %v1769_v0 }
  0x63   :  { %1449 = vmatpush3.msra.mxu0 %v1923_v16 }
  0x64   :  { %1450 = vmatprep.subr.mxu0 %v1769_v0 }
  0x65   :  { %1451 = vmatpush3.msra.mxu0 %v1927_v17 }
  0x66   :  { %1452 = vmatprep.subr.mxu0 %v1769_v0 }
  0x67   :  { %1453 = vmatpush3.msra.mxu0 %v1933_v18 }
  0x68   :  { %1454 = vmatprep.subr.mxu0 %v1769_v0 }
  0x69   :  { %1455 = vmatpush3.msra.mxu0 %v1937_v19 }
  0x6a   :  { %1501 = vmatprep.subr.mxu0 %v1769_v0 }
 0x102   :  { %v202_v21 = vpop.f32.mrf.mxu0 }
 0x103   :  { %v203_v22 = vadd.f32 %v1944_v20, %v202_v21 }
 0x104   :  { %v1381_v23 = vpop.f32.mrf.mxu0 }
 0x105   :  { %v206_v24 = vmax.f32 %v203_v22, 0.0 }
 0x107   :  { %1415 = vmatmul.mubr.f32.vlgmr.msra.gmra.mxu1 %v206_v24 }
 0x108   :  { %1460 = vmatpush3.msk.msra.mxu1 %vm132_vm1, %v1860_v1  ;;  %1463 = vmatprep.mubr.msk.f32.mxu1 %vm1770_vm0, %v1769_v0 }
 0x109   :  { %1461 = vmatprep.subr.mxu1 %v1769_v0  ;;  %v355_v52 = vpop.f32.mrf.mxu0 }
 0x10a   :  { %1462 = vmatpush3.msra.mxu1 %v1862_v2  ;;  %v356_v53 = vadd.f32 %v1944_v20, %v355_v52 }
 0x10b   :  { %1464 = vmatmul.mubr.msk.f32.vlgmr.msra.gmra.mxu1 %vm128_vm2, %v433_v25  ;;  %1466 = vmatprep.subr.mxu1 %v1769_v0  ;;  %v1423_v54 = vpop.f32.mrf.mxu0 }
 0x10c   :  { %1467 = vmatpush3.msra.mxu1 %v1866_v4  ;;  %1498 = vmatprep.mubr.msk.f32.mxu1 %vm1770_vm0, %v1769_v0  ;;  %v359_v55 = vmax.f32 %v356_v53, 0.0 }
 0x10d   :  { %1468 = vmatprep.subr.mxu1 %v1769_v0 }
 0x10e   :  { %1469 = vmatpush3.msra.mxu1 %v1868_v5  ;;  %1457 = vmatmul.mubr.f32.vlgmr.msra.gmra.mxu0 %v359_v55 }
 0x10f   :  { %1470 = vmatprep.subr.mxu1 %v1769_v0  ;;  %1502 = vmatpush3.msk.msra.mxu0 %vm132_vm1, %v1860_v1 }
 0x110   :  { %1471 = vmatpush3.msra.mxu1 %v1874_v6  ;;  %1505 = vmatprep.mubr.msk.f32.mxu0 %vm1770_vm0, %v1769_v0 }
 0x111   :  { %1472 = vmatprep.subr.mxu1 %v1769_v0  ;;  %1503 = vmatprep.subr.mxu0 %v1769_v0 }
 0x112   :  { %1473 = vmatpush3.msra.mxu1 %v1879_v7  ;;  %1504 = vmatpush3.msra.mxu0 %v1862_v2 }
 0x113   :  { %1474 = vmatprep.subr.mxu1 %v1769_v0  ;;  %1506 = vmatmul.mubr.msk.f32.vlgmr.msra.gmra.mxu0 %vm128_vm2, %v581_v56 }
 0x114   :  { %1475 = vmatpush3.msra.mxu1 %v1886_v8  ;;  %1508 = vmatprep.subr.mxu0 %v1769_v0 }
 0x115   :  { %1476 = vmatprep.subr.mxu1 %v1769_v0  ;;  %1509 = vmatpush3.msra.mxu0 %v1866_v4 }
 0x116   :  { %1477 = vmatpush3.msra.mxu1 %v1892_v9  ;;  %1540 = vmatprep.mubr.msk.f32.mxu0 %vm1770_vm0, %v1769_v0 }
 0x117   :  { %1478 = vmatprep.subr.mxu1 %v1769_v0  ;;  %1510 = vmatprep.subr.mxu0 %v1769_v0 }
 0x118   :  { %1479 = vmatpush3.msra.mxu1 %v1899_v10  ;;  %1511 = vmatpush3.msra.mxu0 %v1868_v5 }
 0x119   :  { %1480 = vmatprep.subr.mxu1 %v1769_v0  ;;  %1512 = vmatprep.subr.mxu0 %v1769_v0 }
 0x11a   :  { %1481 = vmatpush3.msra.mxu1 %v1903_v11  ;;  %1513 = vmatpush3.msra.mxu0 %v1874_v6 }
 0x11b   :  { %1482 = vmatprep.subr.mxu1 %v1769_v0  ;;  %1514 = vmatprep.subr.mxu0 %v1769_v0 }
 0x11c   :  { %1483 = vmatpush3.msra.mxu1 %v1907_v12  ;;  %1515 = vmatpush3.msra.mxu0 %v1879_v7 }
 0x11d   :  { %1484 = vmatprep.subr.mxu1 %v1769_v0  ;;  %1516 = vmatprep.subr.mxu0 %v1769_v0 }
 0x11e   :  { %1485 = vmatpush3.msra.mxu1 %v1911_v13  ;;  %1517 = vmatpush3.msra.mxu0 %v1886_v8 }
 0x11f   :  { %1486 = vmatprep.subr.mxu1 %v1769_v0  ;;  %1518 = vmatprep.subr.mxu0 %v1769_v0 }
 0x120   :  { %1487 = vmatpush3.msra.mxu1 %v1915_v14  ;;  %1519 = vmatpush3.msra.mxu0 %v1892_v9 }
 0x121   :  { %1488 = vmatprep.subr.mxu1 %v1769_v0  ;;  %1520 = vmatprep.subr.mxu0 %v1769_v0 }
 0x122   :  { %1489 = vmatpush3.msra.mxu1 %v1919_v15  ;;  %1521 = vmatpush3.msra.mxu0 %v1899_v10 }
 0x123   :  { %1490 = vmatprep.subr.mxu1 %v1769_v0  ;;  %1522 = vmatprep.subr.mxu0 %v1769_v0 }
 0x124   :  { %1491 = vmatpush3.msra.mxu1 %v1923_v16  ;;  %1523 = vmatpush3.msra.mxu0 %v1903_v11 }
 0x125   :  { %1492 = vmatprep.subr.mxu1 %v1769_v0  ;;  %1524 = vmatprep.subr.mxu0 %v1769_v0 }
 0x126   :  { %1493 = vmatpush3.msra.mxu1 %v1927_v17  ;;  %1525 = vmatpush3.msra.mxu0 %v1907_v12 }
 0x127   :  { %1494 = vmatprep.subr.mxu1 %v1769_v0  ;;  %1526 = vmatprep.subr.mxu0 %v1769_v0 }
 0x128   :  { %1495 = vmatpush3.msra.mxu1 %v1933_v18  ;;  %1527 = vmatpush3.msra.mxu0 %v1911_v13 }
 0x129   :  { %1496 = vmatprep.subr.mxu1 %v1769_v0  ;;  %1528 = vmatprep.subr.mxu0 %v1769_v0 }
 0x12a   :  { %1497 = vmatpush3.msra.mxu1 %v1937_v19  ;;  %1529 = vmatpush3.msra.mxu0 %v1915_v14 }
 0x12b   :  { %1543 = vmatprep.subr.mxu1 %v1769_v0  ;;  %1530 = vmatprep.subr.mxu0 %v1769_v0 }
 0x12c   :  { %1531 = vmatpush3.msra.mxu0 %v1919_v15 }
 0x12d   :  { %1532 = vmatprep.subr.mxu0 %v1769_v0 }
 0x12e   :  { %1533 = vmatpush3.msra.mxu0 %v1923_v16 }
 0x12f   :  { %1534 = vmatprep.subr.mxu0 %v1769_v0 }
 0x130   :  { %1535 = vmatpush3.msra.mxu0 %v1927_v17 }
 0x131   :  { %1536 = vmatprep.subr.mxu0 %v1769_v0 }
 0x132   :  { %1537 = vmatpush3.msra.mxu0 %v1933_v18 }
 0x133   :  { %1538 = vmatprep.subr.mxu0 %v1769_v0 }
 0x134   :  { %1539 = vmatpush3.msra.mxu0 %v1937_v19 }
 0x135   :  { %1554 = vmatprep.subr.mxu0 %v1769_v0 }
 0x1c7   :  { %v1989_v26 = vpop.f32.mrf.mxu1 }
 0x1c8   :  { %v280_v44 = vadd.f32 %v2068_v43, %v1989_v26 }
 0x1c9   :  { %v1416_v27 = vpop.f32.mrf.mxu1 }
 0x1cb   :  { %v503_v28 = vpop.f32.mrf.mxu1 }
 0x1cc   :  { %v504_v29 = vadd.f32 %v1944_v20, %v503_v28 }
 0x1cd   :  { %v1465_v30 = vpop.f32.mrf.mxu1 }
 0x1ce   :  { %v507_v31 = vmax.f32 %v504_v29, 0.0  ;;  %v426_v60 = vpop.f32.mrf.mxu0 }
 0x1cf   :  { %v427_v14 = vadd.f32 %v2068_v43, %v426_v60 }
 0x1d0   :  { %1499 = vmatmul.mubr.f32.vlgmr.msra.gmra.mxu1 %v507_v31  ;;  %v1458_v61 = vpop.f32.mrf.mxu0 }
 0x1d1   :  { %1544 = vmatpush3.msra.mxu1 %v1992_v32  ;;  %1551 = vmatprep.mubr.msk.f32.mxu1 %vm1770_vm0, %v1769_v0 }
 0x1d2   :  { %1545 = vmatprep.subr.mxu1 %v1769_v0 }
 0x1d3   :  { %1546 = vmatpush3.msra.mxu1 %v1994_v33  ;;  %v651_v62 = vpop.f32.mrf.mxu0 }
 0x1d4   :  { %1547 = vmatprep.subr.mxu1 %v1769_v0  ;;  %v652_v63 = vadd.f32 %v1944_v20, %v651_v62 }
 0x1d5   :  { %1548 = vmatpush3.msra.mxu1 %v2000_v34  ;;  %v1507_v1 = vpop.f32.mrf.mxu0 }
 0x1d6   :  { %1549 = vmatprep.subr.mxu1 %v1769_v0  ;;  %v655_v2 = vmax.f32 %v652_v63, 0.0 }
 0x1d7   :  { %1550 = vmatpush3.msra.mxu1 %v2004_v35 }
 0x1d8   :  { %1552 = vmatmul.mubr.f32.vlgmr.msra.gmra.mxu1 %v1769_v0  ;;  %1565 = vmatprep.subr.mxu1 %v1769_v0 }
 0x1d9   :  { %1566 = vmatpush3.msra.mxu1 %v1992_v32  ;;  %1573 = vmatprep.mubr.msk.f32.mxu1 %vm1770_vm0, %v1769_v0 }
 0x1da   :  { %1567 = vmatprep.subr.mxu1 %v1769_v0  ;;  %1541 = vmatmul.mubr.f32.vlgmr.msra.gmra.mxu0 %v655_v2 }
 0x1db   :  { %1568 = vmatpush3.msra.mxu1 %v1994_v33  ;;  %1555 = vmatpush3.msra.mxu0 %v1992_v32 }
 0x1dc   :  { %1569 = vmatprep.subr.mxu1 %v1769_v0  ;;  %1562 = vmatprep.mubr.msk.f32.mxu0 %vm1770_vm0, %v1769_v0 }
 0x1dd   :  { %1570 = vmatpush3.msra.mxu1 %v2000_v34  ;;  %1556 = vmatprep.subr.mxu0 %v1769_v0 }
 0x1de   :  { %1571 = vmatprep.subr.mxu1 %v1769_v0  ;;  %1557 = vmatpush3.msra.mxu0 %v1994_v33 }
 0x1df   :  { %1572 = vmatpush3.msra.mxu1 %v2004_v35  ;;  %1558 = vmatprep.subr.mxu0 %v1769_v0 }
 0x1e0   :  { %1587 = vmatprep.subr.mxu1 %v1769_v0  ;;  %1559 = vmatpush3.msra.mxu0 %v2000_v34 }
 0x1e1   :  { %1560 = vmatprep.subr.mxu0 %v1769_v0 }
 0x1e2   :  { %1561 = vmatpush3.msra.mxu0 %v2004_v35 }
 0x1e3   :  { %1576 = vmatprep.subr.mxu0 %v1769_v0 }
 0x290   :  { %v2056_v37 = vpop.f32.mrf.mxu1 }
 0x292   :  { %v1500_v38 = vpop.f32.mrf.mxu1 }
 0x298   :  { %v810_v40 = vpop.f32.mrf.mxu1 }
 0x299   :  { %v811_v41 = vadd.f32 %v2061_v39, %v810_v40 }
 0x29a   :  { %v1553_v42 = vpop.f32.mrf.mxu1  ;;  %v2144_v9 = vpop.f32.mrf.mxu0 }
 0x29b   :  { %822 = vrot.lane.b32.xlu0 %v811_v41, %s1771_s13  ;;  %v814_v45 = vadd.f32 %v811_v41, %v280_v44  ;;  %v723_v56 = vadd.f32 %v2068_v43, %v2144_v9 }
 0x29c   :  { %v1542_v10 = vpop.f32.mrf.mxu0 }
 0x29d   :  { %v1261_v46 = vmul.f32 -1.442695, %v814_v45 }
 0x29f   :  { %1610 = vpow2.f32 %v1261_v46 }
 0x2ac   :  { %v1611_v47 = vpop.eup %1610 }
 0x2ad   :  { %v818_v48 = vadd.f32 1.0, %v1611_v47 }
 0x2af   :  { %1612 = vrcp.f32 %v818_v48 }
 0x2bc   :  { %v2072_v49 = vpop.eup %1612 }
 0x2bd   :  { %v832_v3 = vsub.f32 1.0, %v2072_v49  ;;  %v838_v5 = vmul.f32 0.0, %v2072_v49 }
 0x30d   :  { %v823_v50 = vpop.permute.xlu0 %822 }
 0x30e   :  { %v825_v51 = vmul.f32 %v2072_v49, %v823_v50 }
 0x310   :  { %827 = vrot.lane.b32.xlu0 %v825_v51, %s1771_s13 }
 0x382   :  { %v828_v57 = vpop.permute.xlu0 %827 }
 0x383   :  { %v830_v58 = vadd.f32 %v828_v57, %v280_v44 }
 0x385   :  { %1614 = vtanh.f32 %v830_v58 }
 0x392   :  { %v1615_v59 = vpop.eup %1614 }
 0x393   :  { %834 = vrot.lane.b32.xlu1 %v1615_v59, %s1772_s4 }
 0x405   :  { %v835_v4 = vpop.permute.xlu1 %834 }
 0x406   :  { %v837_v6 = vmul.f32 %v835_v4, %v832_v3  ;;  %v1148_v3 = vld [vmem:[#allocation11 + $0x10] sm:$0xff]  ;;  %v1146_v4 = vld [vmem:[#allocation11] sm:$0xff] }
 0x408   :  { %v839_v7 = vadd.f32 %v838_v5, %v837_v6 }
 0x40a   :  { %842 = vrot.lane.b32.xlu1 %v839_v7, %s1772_s4 }
 0x47c   :  { %v843_v8 = vpop.permute.xlu1 %842 }
 0x47d   :  { %1563 = vmatmul.mubr.msk.f32.vlgmr.msra.gmra.mxu0 %vm740_vm3, %v843_v8 }
 0x47e   :  { %1577 = vmatpush3.msra.mxu0 %v1992_v32  ;;  %1584 = vmatprep.mubr.msk.f32.mxu0 %vm1770_vm0, %v1769_v0 }
 0x47f   :  { %1578 = vmatprep.subr.mxu0 %v1769_v0 }
 0x480   :  { %1579 = vmatpush3.msra.mxu0 %v1994_v33 }
 0x481   :  { %1580 = vmatprep.subr.mxu0 %v1769_v0 }
 0x482   :  { %1581 = vmatpush3.msra.mxu0 %v2000_v34  ;;  %v575_v34 = vadd.f32 %v2068_v43, %v2056_v37  ;;  %v1147_v43 = vld [vmem:[#allocation11 + $0x8] sm:$0xff] }
 0x483   :  { %1582 = vmatprep.subr.mxu0 %v1769_v0 }
 0x484   :  { %1583 = vmatpush3.msra.mxu0 %v2004_v35 }
 0x53d   :  { %v912_v11 = vpop.f32.mrf.mxu0 }
 0x53e   :  { %v913_v12 = vadd.f32 %v2061_v39, %v912_v11 }
 0x53f   :  { %v1564_v13 = vpop.f32.mrf.mxu0 }
 0x540   :  { %924 = vrot.lane.b32.xlu0 %v913_v12, %s1771_s13  ;;  %v916_v15 = vadd.f32 %v913_v12, %v427_v14  ;;  %v1268_v12 = vld [vmem:[%s2188_s8] ss:$0 sm:$0xff] }
 0x542   :  { %v1263_v16 = vmul.f32 -1.442695, %v916_v15 }
 0x544   :  { %1616 = vpow2.f32 %v1263_v16 }
 0x551   :  { %v1617_v17 = vpop.eup %1616 }
 0x552   :  { %v920_v18 = vadd.f32 1.0, %v1617_v17 }
 0x554   :  { %1618 = vrcp.f32 %v920_v18 }
 0x561   :  { %v1619_v19 = vpop.eup %1618 }
 0x562   :  { %v934_v25 = vsub.f32 1.0, %v1619_v19  ;;  %v940_v27 = vmul.f32 %v1619_v19, %v839_v7 }
 0x5b2   :  { %v925_v20 = vpop.permute.xlu0 %924 }
 0x5b3   :  { %v927_v21 = vmul.f32 %v1619_v19, %v925_v20 }
 0x5b5   :  { %929 = vrot.lane.b32.xlu1 %v927_v21, %s1771_s13 }
 0x627   :  { %v930_v22 = vpop.permute.xlu1 %929 }
 0x628   :  { %v932_v23 = vadd.f32 %v930_v22, %v427_v14 }
 0x62a   :  { %1620 = vtanh.f32 %v932_v23 }
 0x637   :  { %v1621_v24 = vpop.eup %1620 }
 0x638   :  { %936 = vrot.lane.b32.xlu0 %v1621_v24, %s1772_s4 }
 0x6aa   :  { %v937_v26 = vpop.permute.xlu0 %936 }
 0x6ab   :  { %v939_v28 = vmul.f32 %v937_v26, %v934_v25 }
 0x6ad   :  { %v941_v29 = vadd.f32 %v940_v27, %v939_v28 }
 0x6af   :  { %944 = vrot.lane.b32.xlu1 %v941_v29, %s1772_s4 }
 0x721   :  { %v945_v30 = vpop.permute.xlu1 %944 }
 0x722   :  { %1574 = vmatmul.mubr.msk.f32.vlgmr.msra.gmra.mxu1 %vm740_vm3, %v945_v30 }
 0x723   :  { %1595 = vmatprep.mubr.msk.f32.mxu1 %vm1770_vm0, %v1769_v0 }
 0x7e2   :  { %v1014_v31 = vpop.f32.mrf.mxu1 }
 0x7e3   :  { %v1015_v32 = vadd.f32 %v2061_v39, %v1014_v31 }
 0x7e4   :  { %v1575_v33 = vpop.f32.mrf.mxu1 }
 0x7e5   :  { %1026 = vrot.lane.b32.xlu0 %v1015_v32, %s1771_s13  ;;  %v1018_v35 = vadd.f32 %v1015_v32, %v575_v34 }
 0x7e7   :  { %v1265_v36 = vmul.f32 -1.442695, %v1018_v35 }
 0x7e9   :  { %1622 = vpow2.f32 %v1265_v36 }
 0x7f6   :  { %v1623_v38 = vpop.eup %1622 }
 0x7f7   :  { %v1022_v40 = vadd.f32 1.0, %v1623_v38 }
 0x7f9   :  { %1624 = vrcp.f32 %v1022_v40 }
 0x806   :  { %v1625_v41 = vpop.eup %1624 }
 0x807   :  { %v1036_v48 = vsub.f32 1.0, %v1625_v41  ;;  %v1042_v37 = vmul.f32 %v1625_v41, %v941_v29 }
 0x857   :  { %v1027_v42 = vpop.permute.xlu0 %1026 }
 0x858   :  { %v1029_v44 = vmul.f32 %v1625_v41, %v1027_v42 }
 0x85a   :  { %1031 = vrot.lane.b32.xlu1 %v1029_v44, %s1771_s13 }
 0x8cc   :  { %v1032_v45 = vpop.permute.xlu1 %1031 }
 0x8cd   :  { %v1034_v46 = vadd.f32 %v1032_v45, %v575_v34 }
 0x8cf   :  { %1626 = vtanh.f32 %v1034_v46 }
 0x8dc   :  { %v1627_v47 = vpop.eup %1626 }
 0x8dd   :  { %1038 = vrot.lane.b32.xlu0 %v1627_v47, %s1772_s4 }
 0x94f   :  { %v1039_v49 = vpop.permute.xlu0 %1038 }
 0x950   :  { %v1041_v50 = vmul.f32 %v1039_v49, %v1036_v48 }
 0x952   :  { %v1043_v51 = vadd.f32 %v1042_v37, %v1041_v50 }
 0x954   :  { %1046 = vrot.lane.b32.xlu1 %v1043_v51, %s1772_s4 }
 0x9c6   :  { %v1047_v52 = vpop.permute.xlu1 %1046 }
 0x9c7   :  { %1585 = vmatmul.mubr.msk.f32.vlgmr.msra.gmra.mxu0 %vm740_vm3, %v1047_v52 }
 0xa87   :  { %v1116_v53 = vpop.f32.mrf.mxu0 }
 0xa88   :  { %v1117_v54 = vadd.f32 %v2061_v39, %v1116_v53  ;;  %v1149_v39 = vld [vmem:[#allocation11 + $0x18] sm:$0xff] }
 0xa89   :  { %v1586_v55 = vpop.f32.mrf.mxu0  ;;  %1588 = vmatpush3.msra.mxu1 %v1149_v39 }
 0xa8a   :  { %1128 = vrot.lane.b32.xlu0 %v1117_v54, %s1771_s13  ;;  %v1120_v57 = vadd.f32 %v1117_v54, %v723_v56  ;;  %1589 = vmatprep.subr.mxu1 %v1769_v0 }
 0xa8b   :  { %1590 = vmatpush3.msra.mxu1 %v1148_v3 }
 0xa8c   :  { %v1267_v58 = vmul.f32 -1.442695, %v1120_v57  ;;  %1591 = vmatprep.subr.mxu1 %v1769_v0 }
 0xa8d   :  { %1592 = vmatpush3.msra.mxu1 %v1147_v43 }
 0xa8e   :  { %1628 = vpow2.f32 %v1267_v58  ;;  %1593 = vmatprep.subr.mxu1 %v1769_v0 }
 0xa8f   :  { %1594 = vmatpush3.msra.mxu1 %v1146_v4 }
 0xa9b   :  { %v1629_v59 = vpop.eup %1628 }
 0xa9c   :  { %v1124_v60 = vadd.f32 1.0, %v1629_v59 }
 0xa9e   :  { %1630 = vrcp.f32 %v1124_v60 }
 0xaab   :  { %v1631_v61 = vpop.eup %1630 }
 0xaac   :  { %v1138_v6 = vsub.f32 1.0, %v1631_v61  ;;  %v1144_v8 = vmul.f32 %v1631_v61, %v1043_v51 }
 0xafc   :  { %v1129_v62 = vpop.permute.xlu0 %1128 }
 0xafd   :  { %v1131_v63 = vmul.f32 %v1631_v61, %v1129_v62 }
 0xaff   :  { %1133 = vrot.lane.b32.xlu1 %v1131_v63, %s1771_s13 }
 0xb71   :  { %v1134_v1 = vpop.permute.xlu1 %1133 }
 0xb72   :  { %v1136_v2 = vadd.f32 %v1134_v1, %v723_v56 }
 0xb74   :  { %1632 = vtanh.f32 %v1136_v2 }
 0xb81   :  { %v1633_v5 = vpop.eup %1632 }
 0xb82   :  { %1140 = vrot.lane.b32.xlu0 %v1633_v5, %s1772_s4 }
 0xbf4   :  { %v1141_v7 = vpop.permute.xlu0 %1140 }
 0xbf5   :  { %v1143_v9 = vmul.f32 %v1141_v7, %v1138_v6 }
 0xbf7   :  { %v1145_v10 = vadd.f32 %v1144_v8, %v1143_v9 }
 0xbf9   :  { %1158 = vrot.lane.b32.xlu1 %v1145_v10, %s1772_s4 }
 0xc6b   :  { %v1159_v11 = vpop.permute.xlu1 %1158 }
 0xc6c   :  { %1596 = vmatmul.mubr.msk.f32.vlgmr.msra.gmra.mxu1 %vm740_vm3, %v1159_v11 }
 0xd2c   :  { %v1228_v0 = vpop.f32.mrf.mxu1 }
 0xd2d   :  { %v1229_v13 = vadd.f32 %v1268_v12, %v1228_v0 }
 0xd2e   :  { %v1597_v14 = vpop.f32.mrf.mxu1 }
 0xd2f   :  { %1232 = vst [vmem:[#allocation12] sm:$0xff] %v1229_v13 }
 0xd30   :  { %1745 = shalt.err (!%p1742_p1)
}
 0xd31   :  { %1242 = dma.vmem_to_hbm [thread:$0]  %s1240_s18, 128, %s2189_s9, [#allocation5]  }
 0xd32   :  { %1760 = dma.done.wait [#allocation5], 128  }
 0xd33   :  { %1761 = vsyncadd [#allocation5], 4294967168 }
 0xd34   :  { %1246 = vsyncpa [#allocation4], 1 }
 0xd35   :  { %1247 = vsyncpa [#allocation7], 1 }
 0xd36   :  { %1248 = vsyncpa [#allocation10], 1 }
 0xd37   :  { %1249 = vsyncpa [#allocation5], 1 }

</bundles_post_ra>
